<compile_context>
chip_gen: v6e
topology: v6e:2x2x1
jax: 0.10.0
libtpu: 0.0.40
codegen_flags: <defaults>
</compile_context>

<pallas_src>
import functools

import jax
import jax.numpy as jnp
from jax.experimental import pallas as pl
from jax.experimental.pallas import tpu as pltpu


def _round_up(x, m):
    return -(-x // m) * m


# ----------------------------------------------------------------------------
# Kernel 1: STAMP attention layer -> session representation sr (bf16, Bp x D).
# ----------------------------------------------------------------------------
def _stamp_layer_kernel(x_ref, mask_ref, invlen_ref, xt_ref,
                        wi_ref, wm_ref, wt_ref, ba_ref, w0_ref,
                        whs_ref, bhs_ref, wht_ref, bht_ref,
                        sr_ref, *, B, L, D):
    def contract(a, w):
        # a @ w.T without an explicit transpose: contract dim 1 of both
        # operands so the MXU is fed directly (no XLU transpose / VMEM copy).
        return jax.lax.dot_general(
            a, w, dimension_numbers=(((1,), (1,)), ((), ())),
            preferred_element_type=jnp.float32)

    x3 = x_ref[...]              # (B, L, D) session item embeddings (f32)
    mask = mask_ref[...]         # (B, L)    {0,1}
    inv_len = invlen_ref[...]    # (B, 1)    1/len
    xt = xt_ref[...]             # (B, D)    last-clicked item embedding

    # masked mean of the session (m_s)
    ms = jnp.sum(x3 * mask[:, :, None], axis=1) * inv_len                # (B, D)

    # attention logits: w0^T sigmoid(W_i x_j + W_m m_s + W_t x_t + b_a)
    ei = contract(x3.reshape(B * L, D), wi_ref[...])                     # (B*L, D)
    em = contract(ms, wm_ref[...])                                       # (B, D)
    et = contract(xt, wt_ref[...]) + ba_ref[...]                         # (B, D)
    pre = ei.reshape(B, L, D) + (em + et)[:, None, :]                    # (B, L, D)
    alpha = jnp.sum(jax.nn.sigmoid(pre) * w0_ref[...][None, :, :], axis=-1)
    alpha = alpha * mask                                                 # (B, L)

    # attended session memory m_a and the final session representation
    ma = jnp.sum(alpha[:, :, None] * x3, axis=1)                         # (B, D)
    hs = jnp.tanh(contract(ma, whs_ref[...]) + bhs_ref[...])
    ht = jnp.tanh(contract(xt, wht_ref[...]) + bht_ref[...])
    # Single bf16 cast here; the sweep kernel consumes sr directly in bf16.
    sr_ref[...] = (hs * ht).astype(sr_ref.dtype)


# ----------------------------------------------------------------------------
# Kernel 2: logits sweep.  Per grid step: sr(Bp,D) @ E_T_tile(D,tn), f32 acc.
# ----------------------------------------------------------------------------
def _logits_sweep_kernel(sr_ref, et_ref, out_ref):
    out_ref[...] = jnp.dot(sr_ref[...], et_ref[...],
                           preferred_element_type=jnp.float32)


# ----------------------------------------------------------------------------
# Forward wrapper.
# ----------------------------------------------------------------------------
def stamp_forward(params, uids, padded_seqs, lens, *, tile_n=16384):
    """Full STAMP forward. `uids` is unused (kept for signature parity)."""
    del uids
    E = params["embedding"]                   # (N, D) f32, max_norm applied at init
    N, D = E.shape
    B, L = padded_seqs.shape

    # Persistent pre-transposed bf16 copy of the table (built once at init and
    # kept in sync with E) -- avoids a whole-table f32->bf16 re-cast per call.
    E_T = params.get("embedding_T_bf16")
    if E_T is None:
        # TODO(synk): fallback cast per call; prefer the persistent copy.
        E_T = E.T.astype(jnp.bfloat16)

    # Pad batch to a multiple of 8 sessions so stores are full sublane groups.
    Bp = max(8, _round_up(B, 8))
    pad = Bp - B
    seqs_p = jnp.pad(padded_seqs, ((0, pad), (0, 0)))
    lens_p = jnp.pad(lens, (0, pad), constant_values=1)

    # --- glue (plain JAX): embedding gather, last-item pick, mask/inv_len ----
    # TODO(synk): nn.Embedding(max_norm=1) renormalizes rows at lookup time in
    # PyTorch; here max_norm is applied once to the whole table at init, and
    # the row gather is done by XLA outside the kernel.
    emb_seqs = E[seqs_p]                                                 # (Bp,L,D)
    xt = jnp.take_along_axis(emb_seqs, (lens_p - 1)[:, None, None], axis=1)[:, 0, :]
    mask = (jnp.arange(L)[None, :] < lens_p[:, None]).astype(jnp.float32)
    inv_len = (1.0 / lens_p.astype(jnp.float32))[:, None]

    # ---------------- kernel 1: session representation sr -------------------
    def full(shape):
        return pl.BlockSpec(shape, lambda i: (0,) * len(shape))

    sr_bf = pl.pallas_call(
        functools.partial(_stamp_layer_kernel, B=Bp, L=L, D=D),
        out_shape=jax.ShapeDtypeStruct((Bp, D), jnp.bfloat16),
        grid_spec=pltpu.PrefetchScalarGridSpec(
            num_scalar_prefetch=0,
            grid=(1,),
            in_specs=[
                full((Bp, L, D)),     # emb_seqs
                full((Bp, L)),        # mask
                full((Bp, 1)),        # inv_len
                full((Bp, D)),        # xt
                full((D, D)),         # W_i
                full((D, D)),         # W_m
                full((D, D)),         # W_t
                full((1, D)),         # b_a
                full((1, D)),         # w0
                full((D, D)),         # W_hs
                full((1, D)),         # b_hs
                full((D, D)),         # W_ht
                full((1, D)),         # b_ht
            ],
            out_specs=full((Bp, D)),
        ),
        compiler_params=pltpu.CompilerParams(
            dimension_semantics=("arbitrary",),
        ),
    )(emb_seqs, mask, inv_len, xt,
      params["W_i"], params["W_m"], params["W_t"], params["b_a"], params["w0"],
      params["W_hs"], params["b_hs"], params["W_ht"], params["b_ht"])

    # ---------------- kernel 2: tiled logits sweep over N --------------------
    tn = min(tile_n, _round_up(N, 128))
    assert tn % 128 == 0, "item tile must be a multiple of 128 lanes"
    Np = _round_up(N, tn)
    # Pad the item axis to a multiple of the tile (zero columns -> zero logits,
    # sliced off below).  For production vocabularies, pre-pad the persistent
    # bf16 table at init so this is a no-op every call.
    E_T_p = E_T if Np == N else jnp.pad(E_T, ((0, 0), (0, Np - N)))

    # VMEM budget from the actual double-buffered tile sizes (+2 MiB slack),
    # clamped well under v7x's 64 MiB physical VMEM.
    e_tile_bytes = D * tn * 2            # bf16 E_T tile
    out_tile_bytes = Bp * tn * 4         # f32 logits tile
    sr_bytes = Bp * D * 2                # bf16 sr (resident)
    vmem_bytes = 2 * (e_tile_bytes + out_tile_bytes + sr_bytes) + (2 << 20)
    vmem_bytes = int(min(max(vmem_bytes, 4 << 20), 48 << 20))

    logits_p = pl.pallas_call(
        _logits_sweep_kernel,
        out_shape=jax.ShapeDtypeStruct((Bp, Np), jnp.float32),
        grid_spec=pltpu.PrefetchScalarGridSpec(
            num_scalar_prefetch=0,
            grid=(Np // tn,),
            in_specs=[
                pl.BlockSpec((Bp, D), lambda j: (0, 0)),   # sr (resident)
                pl.BlockSpec((D, tn), lambda j: (0, j)),   # lane-dense E_T tile
            ],
            out_specs=pl.BlockSpec((Bp, tn), lambda j: (0, j)),
        ),
        compiler_params=pltpu.CompilerParams(
            # sr is a plain input now, so the item axis is independent across
            # steps and can be split across v7x's two TensorCores.
            dimension_semantics=("parallel",),
            vmem_limit_bytes=vmem_bytes,
        ),
    )(sr_bf, E_T_p)

    return logits_p[:B, :N]


# ----------------------------------------------------------------------------
# Pure-JAX reference (same math, full f32) for a correctness check.
# ----------------------------------------------------------------------------
def stamp_reference(params, uids, padded_seqs, lens):
    del uids
    E = params["embedding"]
    B, L = padded_seqs.shape
    emb_seqs = E[padded_seqs]
    xt = jnp.take_along_axis(emb_seqs, (lens - 1)[:, None, None], axis=1)[:, 0, :]
    mask = (jnp.arange(L)[None, :] < lens[:, None]).astype(jnp.float32)
    ms = (emb_seqs * mask[:, :, None]).sum(1) / lens.astype(jnp.float32)[:, None]
    ei = emb_seqs @ params["W_i"].T
    em = ms @ params["W_m"].T
    et = xt @ params["W_t"].T + params["b_a"]
    alpha = jnp.sum(jax.nn.sigmoid(ei + (em + et)[:, None, :]) * params["w0"][None],
                    axis=-1) * mask
    ma = (alpha[:, :, None] * emb_seqs).sum(1)
    hs = jnp.tanh(ma @ params["W_hs"].T + params["b_hs"])
    ht = jnp.tanh(xt @ params["W_ht"].T + params["b_ht"])
    sr = hs * ht
    return sr @ E.T


def init_params(key, num_items, embedding_dim):
    ks = jax.random.split(key, 12)
    D = embedding_dim
    E = 0.1 * jax.random.normal(ks[0], (num_items, D), jnp.float32)
    # nn.Embedding(max_norm=1): rows with norm > 1 are renormalized to norm 1.
    norms = jnp.linalg.norm(E, axis=-1, keepdims=True)
    E = E * jnp.where(norms > 1.0, 1.0 / norms, 1.0)
    w = lambda k: 0.1 * jax.random.normal(k, (D, D), jnp.float32)
    b = lambda k: 0.1 * jax.random.normal(k, (1, D), jnp.float32)
    return {
        "embedding": E,
        # Persistent pre-transposed bf16 copy used by the logits sweep; keep it
        # in sync with `embedding` whenever the table is updated.
        "embedding_T_bf16": E.T.astype(jnp.bfloat16),
        "W_i": w(ks[1]), "W_m": w(ks[2]), "W_t": w(ks[3]),
        "b_a": b(ks[4]), "w0": 0.1 * jax.random.normal(ks[5], (1, D), jnp.float32),
        "W_hs": w(ks[6]), "b_hs": b(ks[7]),
        "W_ht": w(ks[8]), "b_ht": b(ks[9]),
    }


if __name__ == "__main__":
    B, L, D, N = 4, 8, 32, 2048

    key = jax.random.PRNGKey(0)
    kp, ks, kl, ku = jax.random.split(key, 4)

    params = init_params(kp, N, D)
    padded_seqs = jax.random.randint(ks, (B, L), 0, N, dtype=jnp.int32)
    lens = jax.random.randint(kl, (B,), 1, L + 1, dtype=jnp.int32)
    uids = jax.random.randint(ku, (B,), 0, 1000, dtype=jnp.int32)

    ref = stamp_reference(params, uids, padded_seqs, lens)

    # Default tile (single sweep step at this toy N).
    logits = stamp_forward(params, uids, padded_seqs, lens)
    logits = jax.block_until_ready(logits)
    assert logits.shape == (B, N)
    # E / sr are bf16 for the logits matmul (f32 accumulation), so compare
    # against the pure-f32 reference with a looser tolerance.
    assert jnp.allclose(logits, ref, atol=5e-2, rtol=5e-2), "mismatch (default tile)"

    # Small non-dividing tile: exercises the multi-step parallel sweep and the
    # item-axis padding path.
    logits2 = stamp_forward(params, uids, padded_seqs, lens, tile_n=768)
    logits2 = jax.block_until_ready(logits2)
    assert logits2.shape == (B, N)
    assert jnp.allclose(logits2, ref, atol=5e-2, rtol=5e-2), "mismatch (tiled sweep)"

    print("KERNEL_OK")
</pallas_src>

<mosaic_0001>
module attributes {stable_mosaic.version = 11 : i64} {
  func.func @_stamp_layer_kernel(%arg0: i32, %arg1: memref<8x8x32xf32, #tpu.memory_space<vmem>>, %arg2: memref<8x8xf32, #tpu.memory_space<vmem>>, %arg3: memref<8x1xf32, #tpu.memory_space<vmem>>, %arg4: memref<8x32xf32, #tpu.memory_space<vmem>>, %arg5: memref<32x32xf32, #tpu.memory_space<vmem>>, %arg6: memref<32x32xf32, #tpu.memory_space<vmem>>, %arg7: memref<32x32xf32, #tpu.memory_space<vmem>>, %arg8: memref<1x32xf32, #tpu.memory_space<vmem>>, %arg9: memref<1x32xf32, #tpu.memory_space<vmem>>, %arg10: memref<32x32xf32, #tpu.memory_space<vmem>>, %arg11: memref<1x32xf32, #tpu.memory_space<vmem>>, %arg12: memref<32x32xf32, #tpu.memory_space<vmem>>, %arg13: memref<1x32xf32, #tpu.memory_space<vmem>>, %arg14: memref<8x32xbf16, #tpu.memory_space<vmem>>) attributes {dimension_semantics = [#tpu.dimension_semantics<arbitrary>], iteration_bounds = array<i64: 1>, scalar_prefetch = 0 : i64, scratch_operands = 0 : i64, tpu.core_type = #tpu.core_type<tc>, window_params = [{pipeline_mode = #tpu.pipeline_mode<synchronous>, transform_indices = @transform_0, window_bounds = array<i64: 8, 8, 32>}, {pipeline_mode = #tpu.pipeline_mode<synchronous>, transform_indices = @transform_1, window_bounds = array<i64: 8, 8>}, {pipeline_mode = #tpu.pipeline_mode<synchronous>, transform_indices = @transform_2, window_bounds = array<i64: 8, 1>}, {pipeline_mode = #tpu.pipeline_mode<synchronous>, transform_indices = @transform_3, window_bounds = array<i64: 8, 32>}, {pipeline_mode = #tpu.pipeline_mode<synchronous>, transform_indices = @transform_4, window_bounds = array<i64: 32, 32>}, {pipeline_mode = #tpu.pipeline_mode<synchronous>, transform_indices = @transform_5, window_bounds = array<i64: 32, 32>}, {pipeline_mode = #tpu.pipeline_mode<synchronous>, transform_indices = @transform_6, window_bounds = array<i64: 32, 32>}, {pipeline_mode = #tpu.pipeline_mode<synchronous>, transform_indices = @transform_7, window_bounds = array<i64: 1, 32>}, {pipeline_mode = #tpu.pipeline_mode<synchronous>, transform_indices = @transform_8, window_bounds = array<i64: 1, 32>}, {pipeline_mode = #tpu.pipeline_mode<synchronous>, transform_indices = @transform_9, window_bounds = array<i64: 32, 32>}, {pipeline_mode = #tpu.pipeline_mode<synchronous>, transform_indices = @transform_10, window_bounds = array<i64: 1, 32>}, {pipeline_mode = #tpu.pipeline_mode<synchronous>, transform_indices = @transform_11, window_bounds = array<i64: 32, 32>}, {pipeline_mode = #tpu.pipeline_mode<synchronous>, transform_indices = @transform_12, window_bounds = array<i64: 1, 32>}, {pipeline_mode = #tpu.pipeline_mode<synchronous>, transform_indices = @transform_13, window_bounds = array<i64: 8, 32>}]} {
    %c0 = arith.constant 0 : index
    %c0_0 = arith.constant 0 : index
    %c0_1 = arith.constant 0 : index
    %0 = vector.load %arg1[%c0, %c0_0, %c0_1] : memref<8x8x32xf32, #tpu.memory_space<vmem>>, vector<8x8x32xf32>
    %c0_2 = arith.constant 0 : index
    %c0_3 = arith.constant 0 : index
    %1 = vector.load %arg2[%c0_2, %c0_3] : memref<8x8xf32, #tpu.memory_space<vmem>>, vector<8x8xf32>
    %c0_4 = arith.constant 0 : index
    %c0_5 = arith.constant 0 : index
    %2 = vector.load %arg3[%c0_4, %c0_5] : memref<8x1xf32, #tpu.memory_space<vmem>>, vector<8x1xf32>
    %c0_6 = arith.constant 0 : index
    %c0_7 = arith.constant 0 : index
    %3 = vector.load %arg4[%c0_6, %c0_7] : memref<8x32xf32, #tpu.memory_space<vmem>>, vector<8x32xf32>
    %4 = vector.shape_cast %1 : vector<8x8xf32> to vector<8x8x1xf32>
    %5 = vector.broadcast %4 : vector<8x8x1xf32> to vector<8x8x32xf32>
    %6 = arith.mulf %0, %5 : vector<8x8x32xf32>
    %cst = arith.constant dense<0.000000e+00> : vector<8x32xf32>
    %7 = vector.multi_reduction <add>, %6, %cst [1] : vector<8x8x32xf32> to vector<8x32xf32>
    %8 = vector.broadcast %2 : vector<8x1xf32> to vector<8x32xf32>
    %9 = arith.mulf %7, %8 : vector<8x32xf32>
    %10 = vector.shape_cast %0 : vector<8x8x32xf32> to vector<64x32xf32>
    %c0_8 = arith.constant 0 : index
    %c0_9 = arith.constant 0 : index
    %11 = vector.load %arg5[%c0_8, %c0_9] : memref<32x32xf32, #tpu.memory_space<vmem>>, vector<32x32xf32>
    %cst_10 = arith.constant dense<0.000000e+00> : vector<64x32xf32>
    %12 = tpu.matmul %10, %11, %cst_10 {dimension_numbers = #tpu.dot_dimension_numbers<[1], [1], [0], [0], [0, 0, 1, 0], [], []>} : vector<64x32xf32>, vector<32x32xf32>, vector<64x32xf32> -> vector<64x32xf32>
    %c0_11 = arith.constant 0 : index
    %c0_12 = arith.constant 0 : index
    %13 = vector.load %arg6[%c0_11, %c0_12] : memref<32x32xf32, #tpu.memory_space<vmem>>, vector<32x32xf32>
    %cst_13 = arith.constant dense<0.000000e+00> : vector<8x32xf32>
    %14 = tpu.matmul %9, %13, %cst_13 {dimension_numbers = #tpu.dot_dimension_numbers<[1], [1], [0], [0], [0, 0, 1, 0], [], []>} : vector<8x32xf32>, vector<32x32xf32>, vector<8x32xf32> -> vector<8x32xf32>
    %c0_14 = arith.constant 0 : index
    %c0_15 = arith.constant 0 : index
    %15 = vector.load %arg7[%c0_14, %c0_15] : memref<32x32xf32, #tpu.memory_space<vmem>>, vector<32x32xf32>
    %cst_16 = arith.constant dense<0.000000e+00> : vector<8x32xf32>
    %16 = tpu.matmul %3, %15, %cst_16 {dimension_numbers = #tpu.dot_dimension_numbers<[1], [1], [0], [0], [0, 0, 1, 0], [], []>} : vector<8x32xf32>, vector<32x32xf32>, vector<8x32xf32> -> vector<8x32xf32>
    %c0_17 = arith.constant 0 : index
    %c0_18 = arith.constant 0 : index
    %17 = vector.load %arg8[%c0_17, %c0_18] : memref<1x32xf32, #tpu.memory_space<vmem>>, vector<1x32xf32>
    %18 = vector.broadcast %17 : vector<1x32xf32> to vector<8x32xf32>
    %19 = arith.addf %16, %18 : vector<8x32xf32>
    %20 = vector.shape_cast %12 : vector<64x32xf32> to vector<8x8x32xf32>
    %21 = arith.addf %14, %19 : vector<8x32xf32>
    %22 = vector.shape_cast %21 : vector<8x32xf32> to vector<8x1x32xf32>
    %23 = vector.broadcast %22 : vector<8x1x32xf32> to vector<8x8x32xf32>
    %24 = arith.addf %20, %23 : vector<8x8x32xf32>
    %25 = arith.negf %24 : vector<8x8x32xf32>
    %26 = math.exp %25 : vector<8x8x32xf32>
    %cst_19 = arith.constant 1.000000e+00 : f32
    %27 = vector.broadcast %cst_19 : f32 to vector<8x8x32xf32>
    %28 = arith.addf %27, %26 : vector<8x8x32xf32>
    %29 = arith.divf %27, %28 : vector<8x8x32xf32>
    %c0_20 = arith.constant 0 : index
    %c0_21 = arith.constant 0 : index
    %30 = vector.load %arg9[%c0_20, %c0_21] : memref<1x32xf32, #tpu.memory_space<vmem>>, vector<1x32xf32>
    %31 = vector.shape_cast %30 : vector<1x32xf32> to vector<1x1x32xf32>
    %32 = vector.broadcast %31 : vector<1x1x32xf32> to vector<8x8x32xf32>
    %33 = arith.mulf %29, %32 : vector<8x8x32xf32>
    %cst_22 = arith.constant dense<0.000000e+00> : vector<8x8xf32>
    %34 = vector.multi_reduction <add>, %33, %cst_22 [2] : vector<8x8x32xf32> to vector<8x8xf32>
    %35 = arith.mulf %34, %1 : vector<8x8xf32>
    %36 = vector.shape_cast %35 : vector<8x8xf32> to vector<8x8x1xf32>
    %37 = vector.broadcast %36 : vector<8x8x1xf32> to vector<8x8x32xf32>
    %38 = arith.mulf %37, %0 : vector<8x8x32xf32>
    %cst_23 = arith.constant dense<0.000000e+00> : vector<8x32xf32>
    %39 = vector.multi_reduction <add>, %38, %cst_23 [1] : vector<8x8x32xf32> to vector<8x32xf32>
    %c0_24 = arith.constant 0 : index
    %c0_25 = arith.constant 0 : index
    %40 = vector.load %arg10[%c0_24, %c0_25] : memref<32x32xf32, #tpu.memory_space<vmem>>, vector<32x32xf32>
    %cst_26 = arith.constant dense<0.000000e+00> : vector<8x32xf32>
    %41 = tpu.matmul %39, %40, %cst_26 {dimension_numbers = #tpu.dot_dimension_numbers<[1], [1], [0], [0], [0, 0, 1, 0], [], []>} : vector<8x32xf32>, vector<32x32xf32>, vector<8x32xf32> -> vector<8x32xf32>
    %c0_27 = arith.constant 0 : index
    %c0_28 = arith.constant 0 : index
    %42 = vector.load %arg11[%c0_27, %c0_28] : memref<1x32xf32, #tpu.memory_space<vmem>>, vector<1x32xf32>
    %43 = vector.broadcast %42 : vector<1x32xf32> to vector<8x32xf32>
    %44 = arith.addf %41, %43 : vector<8x32xf32>
    %45 = math.tanh %44 : vector<8x32xf32>
    %c0_29 = arith.constant 0 : index
    %c0_30 = arith.constant 0 : index
    %46 = vector.load %arg12[%c0_29, %c0_30] : memref<32x32xf32, #tpu.memory_space<vmem>>, vector<32x32xf32>
    %cst_31 = arith.constant dense<0.000000e+00> : vector<8x32xf32>
    %47 = tpu.matmul %3, %46, %cst_31 {dimension_numbers = #tpu.dot_dimension_numbers<[1], [1], [0], [0], [0, 0, 1, 0], [], []>} : vector<8x32xf32>, vector<32x32xf32>, vector<8x32xf32> -> vector<8x32xf32>
    %c0_32 = arith.constant 0 : index
    %c0_33 = arith.constant 0 : index
    %48 = vector.load %arg13[%c0_32, %c0_33] : memref<1x32xf32, #tpu.memory_space<vmem>>, vector<1x32xf32>
    %49 = vector.broadcast %48 : vector<1x32xf32> to vector<8x32xf32>
    %50 = arith.addf %47, %49 : vector<8x32xf32>
    %51 = math.tanh %50 : vector<8x32xf32>
    %52 = arith.mulf %45, %51 : vector<8x32xf32>
    %53 = arith.truncf %52 : vector<8x32xf32> to vector<8x32xbf16>
    %c0_34 = arith.constant 0 : index
    %c0_35 = arith.constant 0 : index
    %54 = vector.load %arg14[%c0_34, %c0_35] : memref<8x32xbf16, #tpu.memory_space<vmem>>, vector<8x32xbf16>
    tpu.vector_store %arg14[%c0_34, %c0_35], %53 {strides = array<i32>} : memref<8x32xbf16, #tpu.memory_space<vmem>>, vector<8x32xbf16>,
    return
  }
  func.func @transform_0(%arg0: i32) -> (i32, i32, i32) {
    %c0_i32 = arith.constant 0 : i32
    %c0_i32_0 = arith.constant 0 : i32
    %c0_i32_1 = arith.constant 0 : i32
    %c0_i32_2 = arith.constant 0 : i32
    return %c0_i32, %c0_i32_0, %c0_i32_1 : i32, i32, i32
  }
  func.func @transform_1(%arg0: i32) -> (i32, i32) {
    %c0_i32 = arith.constant 0 : i32
    %c0_i32_0 = arith.constant 0 : i32
    %c0_i32_1 = arith.constant 0 : i32
    return %c0_i32, %c0_i32_0 : i32, i32
  }
  func.func @transform_2(%arg0: i32) -> (i32, i32) {
    %c0_i32 = arith.constant 0 : i32
    %c0_i32_0 = arith.constant 0 : i32
    %c0_i32_1 = arith.constant 0 : i32
    return %c0_i32, %c0_i32_0 : i32, i32
  }
  func.func @transform_3(%arg0: i32) -> (i32, i32) {
    %c0_i32 = arith.constant 0 : i32
    %c0_i32_0 = arith.constant 0 : i32
    %c0_i32_1 = arith.constant 0 : i32
    return %c0_i32, %c0_i32_0 : i32, i32
  }
  func.func @transform_4(%arg0: i32) -> (i32, i32) {
    %c0_i32 = arith.constant 0 : i32
    %c0_i32_0 = arith.constant 0 : i32
    %c0_i32_1 = arith.constant 0 : i32
    return %c0_i32, %c0_i32_0 : i32, i32
  }
  func.func @transform_5(%arg0: i32) -> (i32, i32) {
    %c0_i32 = arith.constant 0 : i32
    %c0_i32_0 = arith.constant 0 : i32
    %c0_i32_1 = arith.constant 0 : i32
    return %c0_i32, %c0_i32_0 : i32, i32
  }
  func.func @transform_6(%arg0: i32) -> (i32, i32) {
    %c0_i32 = arith.constant 0 : i32
    %c0_i32_0 = arith.constant 0 : i32
    %c0_i32_1 = arith.constant 0 : i32
    return %c0_i32, %c0_i32_0 : i32, i32
  }
  func.func @transform_7(%arg0: i32) -> (i32, i32) {
    %c0_i32 = arith.constant 0 : i32
    %c0_i32_0 = arith.constant 0 : i32
    %c0_i32_1 = arith.constant 0 : i32
    return %c0_i32, %c0_i32_0 : i32, i32
  }
  func.func @transform_8(%arg0: i32) -> (i32, i32) {
    %c0_i32 = arith.constant 0 : i32
    %c0_i32_0 = arith.constant 0 : i32
    %c0_i32_1 = arith.constant 0 : i32
    return %c0_i32, %c0_i32_0 : i32, i32
  }
  func.func @transform_9(%arg0: i32) -> (i32, i32) {
    %c0_i32 = arith.constant 0 : i32
    %c0_i32_0 = arith.constant 0 : i32
    %c0_i32_1 = arith.constant 0 : i32
    return %c0_i32, %c0_i32_0 : i32, i32
  }
  func.func @transform_10(%arg0: i32) -> (i32, i32) {
    %c0_i32 = arith.constant 0 : i32
    %c0_i32_0 = arith.constant 0 : i32
    %c0_i32_1 = arith.constant 0 : i32
    return %c0_i32, %c0_i32_0 : i32, i32
  }
  func.func @transform_11(%arg0: i32) -> (i32, i32) {
    %c0_i32 = arith.constant 0 : i32
    %c0_i32_0 = arith.constant 0 : i32
    %c0_i32_1 = arith.constant 0 : i32
    return %c0_i32, %c0_i32_0 : i32, i32
  }
  func.func @transform_12(%arg0: i32) -> (i32, i32) {
    %c0_i32 = arith.constant 0 : i32
    %c0_i32_0 = arith.constant 0 : i32
    %c0_i32_1 = arith.constant 0 : i32
    return %c0_i32, %c0_i32_0 : i32, i32
  }
  func.func @transform_13(%arg0: i32) -> (i32, i32) {
    %c0_i32 = arith.constant 0 : i32
    %c0_i32_0 = arith.constant 0 : i32
    %c0_i32_1 = arith.constant 0 : i32
    return %c0_i32, %c0_i32_0 : i32, i32
  }
}

</mosaic_0001>

<bundles_post_ra>
// kernel: tpu_custom_call.1
= control target key start
LH: loop header
LB: loop body
LE: loop exit
PB: predicated region body
PF: predicated region fallthrough
CT: control target
= control target key end

     0   :  { %18 = vsyncpa [#allocation3], 0  ;;  %s1938_s0 = inlined_call_operand.hbm [shape: f32[8,8,32], index: 0, kind: input, shape index: {}]   ;;  %s1939_s1 = inlined_call_operand.vmem [shape: f32[8,8], index: 1, kind: input, shape index: {}]   ;;  %s1940_s2 = inlined_call_operand.vmem [shape: f32[8,1], index: 2, kind: input, shape index: {}]   ;;  %s1941_s3 = inlined_call_operand.hbm [shape: f32[8,32], index: 3, kind: input, shape index: {}]   ;;  %s1942_s4 = inlined_call_operand.hbm [shape: f32[32,32], index: 4, kind: input, shape index: {}]   ;;  %s1943_s5 = inlined_call_operand.hbm [shape: f32[32,32], index: 5, kind: input, shape index: {}]   ;;  %s1944_s6 = inlined_call_operand.hbm [shape: f32[32,32], index: 6, kind: input, shape index: {}]   ;;  %s1945_s7 = inlined_call_operand.vmem [shape: f32[1,32], index: 7, kind: input, shape index: {}]   ;;  %s1946_s8 = inlined_call_operand.vmem [shape: f32[1,32], index: 8, kind: input, shape index: {}]   ;;  %s1947_s9 = inlined_call_operand.hbm [shape: f32[32,32], index: 9, kind: input, shape index: {}]   ;;  %s1948_s10 = inlined_call_operand.vmem [shape: f32[1,32], index: 10, kind: input, shape index: {}]   ;;  %s1949_s11 = inlined_call_operand.hbm [shape: f32[32,32], index: 11, kind: input, shape index: {}]   ;;  %s1950_s12 = inlined_call_operand.vmem [shape: f32[1,32], index: 12, kind: input, shape index: {}]   ;;  %s1951_s13 = inlined_call_operand.hbm [shape: bf16[8,32], index: 13, kind: output, shape index: {}]  }
   0x1   :  { %19 = vsyncpa [#allocation6], 0 }
   0x2   :  { %20 = vsyncpa [#allocation9], 0 }
   0x3   :  { %21 = vsyncpa [#allocation12], 0 }
   0x4   :  { %22 = vsyncpa [#allocation4], 0  ;;  %s1606_s25 = smov [#allocation5]  }
   0x5   :  { %s45_s26 = sshll.u32 %s1606_s25, 4  ;;  %s46_s26 = int_to_ptr.vmem [resolvable:$true] %s45_s26 }
   0x6   :  { %s1444_s27 = scalar_lea.vmem %s46_s26, 128  ;;  %p1449_p1 = scmp.lt.s32.totalorder %s46_s26, %s46_s26 }
   0x7   :  { %p1445_p0 = scmp.ne.s32.totalorder %s46_s26, %s1444_s27  ;;  %p1450_p2 = scmp.lt.s32.totalorder %s1444_s27, %s1444_s27 }
   0x9   :  { %p1451_p3 = por %p1450_p2, %p1449_p1 }
   0xb   :  { %p1452_p4 = pnand %p1451_p3, %p1445_p0 }
   0xd   :  { %1455 = shalt.err (!%p1452_p4)
}
   0xe   :  { %48 = dma.hbm_to_vmem [thread:$0]  %s1941_s3, 128, %s46_s26, [#allocation6]  }
   0xf   :  { %s1607_s30 = smov [#allocation8]   ;;  %s1608_s15 = smov [#allocation11]  }
  0x10   :  { %s66_s14 = sshll.u32 %s1607_s30, 4  ;;  %s94_s16 = sshll.u32 %s1608_s15, 4  ;;  %s67_s14 = int_to_ptr.vmem [resolvable:$true] %s66_s14  ;;  %s95_s16 = int_to_ptr.vmem [resolvable:$true] %s94_s16 }
  0x11   :  { %s1464_s17 = scalar_lea.vmem %s67_s14, 512  ;;  %p1469_p6 = scmp.lt.s32.totalorder %s67_s14, %s67_s14 }
  0x12   :  { %p1465_p5 = scmp.ne.s32.totalorder %s67_s14, %s1464_s17  ;;  %p1470_p7 = scmp.lt.s32.totalorder %s1464_s17, %s1464_s17 }
  0x14   :  { %p1471_p8 = por %p1470_p7, %p1469_p6 }
  0x16   :  { %p1472_p9 = pnand %p1471_p8, %p1465_p5 }
  0x18   :  { %1475 = shalt.err (!%p1472_p9)
}
  0x19   :  { %s1609_s18 = smov 128   ;;  %s1610_s19 = smov 8  }
  0x1a   :  { %72 = dma.hbm_to_vmem [thread:$0]  %s1943_s5, 512, %s67_s14, [#allocation9], %s1609_s18, %s1609_s18, %s1610_s19  }
  0x1b   :  { %s1484_s3 = scalar_lea.vmem %s95_s16, 512  ;;  %p1489_p11 = scmp.lt.s32.totalorder %s95_s16, %s95_s16 }
  0x1c   :  { %p1485_p10 = scmp.ne.s32.totalorder %s95_s16, %s1484_s3  ;;  %p1490_p12 = scmp.lt.s32.totalorder %s1484_s3, %s1484_s3 }
  0x1e   :  { %p1491_p13 = por %p1490_p12, %p1489_p11 }
  0x20   :  { %p1492_p0 = pnand %p1491_p13, %p1485_p10 }
  0x22   :  { %1495 = shalt.err (!%p1492_p0)
}
  0x23   :  { %100 = dma.hbm_to_vmem [thread:$0]  %s1947_s9, 512, %s95_s16, [#allocation12], %s1609_s18, %s1609_s18, %s1610_s19  }
  0x24   :  { %s1611_s24 = smov [#allocation2]   ;;  %s1612_s26 = smov [#allocation7]  }
  0x25   :  { %s28_s25 = sshll.u32 %s1611_s24, 4  ;;  %s54_s5 = sshll.u32 %s1612_s26, 4  ;;  %s29_s25 = int_to_ptr.vmem [resolvable:$true] %s28_s25  ;;  %s55_s5 = int_to_ptr.vmem [resolvable:$true] %s54_s5 }
  0x26   :  { %s1504_s27 = scalar_lea.vmem %s29_s25, 1024  ;;  %p1509_p2 = scmp.lt.s32.totalorder %s29_s25, %s29_s25 }
  0x27   :  { %p1505_p1 = scmp.ne.s32.totalorder %s29_s25, %s1504_s27  ;;  %p1510_p3 = scmp.lt.s32.totalorder %s1504_s27, %s1504_s27 }
  0x29   :  { %p1511_p4 = por %p1510_p3, %p1509_p2 }
  0x2b   :  { %p1512_p5 = pnand %p1511_p4, %p1505_p1 }
  0x2d   :  { %1515 = shalt.err (!%p1512_p5)
}
  0x2e   :  { %34 = dma.hbm_to_vmem [thread:$0]  %s1938_s0, 1024, %s29_s25, [#allocation3], %s1609_s18, %s1609_s18, %s1610_s19  }
  0x2f   :  { %s1524_s9 = scalar_lea.vmem %s55_s5, 512  ;;  %p1529_p7 = scmp.lt.s32.totalorder %s55_s5, %s55_s5 }
  0x30   :  { %p1525_p6 = scmp.ne.s32.totalorder %s55_s5, %s1524_s9  ;;  %p1530_p8 = scmp.lt.s32.totalorder %s1524_s9, %s1524_s9 }
  0x32   :  { %p1531_p9 = por %p1530_p8, %p1529_p7 }
  0x34   :  { %p1532_p10 = pnand %p1531_p9, %p1525_p6 }
  0x36   :  { %1535 = shalt.err (!%p1532_p10)
}
  0x37   :  { %60 = dma.hbm_to_vmem [thread:$0]  %s1942_s4, 512, %s55_s5, [#allocation6], %s1609_s18, %s1609_s18, %s1610_s19  }
  0x38   :  { %s1613_s15 = smov [#allocation10]   ;;  %s1614_s17 = smov [#allocation13]  }
  0x39   :  { %s78_s16 = sshll.u32 %s1613_s15, 4  ;;  %s108_s0 = sshll.u32 %s1614_s17, 4  ;;  %s79_s16 = int_to_ptr.vmem [resolvable:$true] %s78_s16  ;;  %s109_s0 = int_to_ptr.vmem [resolvable:$true] %s108_s0 }
  0x3a   :  { %s1544_s20 = scalar_lea.vmem %s79_s16, 512  ;;  %p1549_p12 = scmp.lt.s32.totalorder %s79_s16, %s79_s16 }
  0x3b   :  { %p1545_p11 = scmp.ne.s32.totalorder %s79_s16, %s1544_s20  ;;  %p1550_p13 = scmp.lt.s32.totalorder %s1544_s20, %s1544_s20 }
  0x3d   :  { %p1551_p0 = por %p1550_p13, %p1549_p12 }
  0x3f   :  { %p1552_p1 = pnand %p1551_p0, %p1545_p11 }
  0x41   :  { %1555 = shalt.err (!%p1552_p1)
}
  0x42   :  { %84 = dma.hbm_to_vmem [thread:$0]  %s1944_s6, 512, %s79_s16, [#allocation9], %s1609_s18, %s1609_s18, %s1610_s19  }
  0x43   :  { %s1564_s4 = scalar_lea.vmem %s109_s0, 512  ;;  %p1569_p3 = scmp.lt.s32.totalorder %s109_s0, %s109_s0 }
  0x44   :  { %p1565_p2 = scmp.ne.s32.totalorder %s109_s0, %s1564_s4  ;;  %p1570_p4 = scmp.lt.s32.totalorder %s1564_s4, %s1564_s4 }
  0x46   :  { %p1571_p5 = por %p1570_p4, %p1569_p3 }
  0x48   :  { %p1572_p6 = pnand %p1571_p5, %p1565_p2 }
  0x4a   :  { %1575 = shalt.err (!%p1572_p6)
}
  0x4b   :  { %114 = dma.hbm_to_vmem [thread:$0]  %s1949_s11, 512, %s109_s0, [#allocation12], %s1609_s18, %s1609_s18, %s1610_s19  }
  0x4c   :  { %1596 = dma.done.wait [#allocation3], 1024  }
  0x4d   :  { %1597 = vsyncadd [#allocation3], 4294966272 }
  0x4e   :  { %1598 = dma.done.wait [#allocation6], 640  }
  0x4f   :  { %1599 = vsyncadd [#allocation6], 4294966656 }
  0x50   :  { %1600 = dma.done.wait [#allocation9], 1024  }
  0x51   :  { %1601 = vsyncadd [#allocation9], 4294966272 }
  0x52   :  { %1602 = dma.done.wait [#allocation12], 1024  }
  0x53   :  { %1603 = vsyncadd [#allocation12], 4294966272  ;;  %v149_v0 = vlaneseq  ;;  %v1615_v1 = vmov 0   ;;  %v146_v7 = vld [vmem:[%s1939_s1] sm:$0xff]  ;;  %vm213_vm0 = vcmask 261120   ;;  %v299_v16 = vld [vmem:[#allocation7 + $0x10] sm:$0xff] }
  0x54   :  { %1398 = vset.pattern.permute.xlu0 %v1615_v1  ;;  %1399 = vset.pattern.permute.xlu1 %v1615_v1  ;;  %v1743_v10 = vld [vmem:[#allocation2] sm:$0xff]  ;;  %v298_v21 = vld [vmem:[#allocation7 + $0x8] sm:$0xff]  ;;  %v1616_v22 = vmov 0.0   ;;  %v297_v26 = vld [vmem:[#allocation7] sm:$0xff]  ;;  %vm1617_vm1 = vmmov 0   ;;  %vm551_vm2 = vcmask 1041409  }
  0x55   :  { %v1729_v2 = vshrl.u32 %v149_v0, 7  ;;  %v300_v11 = vld [vmem:[#allocation7 + $0x18] sm:$0xff]  ;;  %1328 = vmatprep.mubr.msk.f32.mxu0 %vm213_vm0, %v1743_v10  ;;  %1340 = vmatprep.subr.mxu1 %v1616_v22  ;;  %v448_v27 = vld [vmem:[#allocation10 + $0x10] sm:$0xff]  ;;  %v447_v29 = vld [vmem:[#allocation10 + $0x8] sm:$0xff]  ;;  %vm554_vm3 = vcmask 1042434   ;;  %vm557_vm4 = vcmask 1043459  }
  0x56   :  { %1320 = vmatprep.subr.msk.mxu0 %vm213_vm0, %v300_v11  ;;  %v449_v23 = vld [vmem:[#allocation10 + $0x18] sm:$0xff]  ;;  %v1785_v31 = vld [vmem:[#allocation2 + $0x8] sm:$0xff]  ;;  %v1788_v33 = vld [vmem:[#allocation2 + $0x10] sm:$0xff]  ;;  %1348 = vmatprep.mubr.msk.f32.mxu1 %vm1617_vm1, %v1616_v22  ;;  %vm560_vm5 = vcmask 1044484   ;;  %vm563_vm6 = vcmask 1045509   ;;  %vm566_vm7 = vcmask 1046534  }
  0x57   :  { %v158_v3 = vsub.s32 1, %v1729_v2  ;;  %v1733_v4 = vsub.s32 0, %v1729_v2  ;;  %v165_v5 = vsub.s32 2, %v1729_v2  ;;  %v172_v6 = vsub.s32 3, %v1729_v2  ;;  %1321 = vmatpush3.xpose.msk.msra.mxu0 %vm213_vm0, %v300_v11  ;;  %1341 = vmatpush3.xpose.msk.msra.mxu1 %vm213_vm0, %v449_v23  ;;  %v147_v28 = vld [vmem:[%s1940_s2] sm:$0xff]  ;;  %v446_v32 = vld [vmem:[#allocation10] sm:$0xff] }
  0x58   :  { %v179_v14 = vsub.s32 4, %v1729_v2  ;;  %v186_v15 = vsub.s32 5, %v1729_v2  ;;  %1322 = vmatprep.subr.msk.mxu0 %vm213_vm0, %v299_v16  ;;  %v193_v19 = vsub.s32 6, %v1729_v2  ;;  %v200_v20 = vsub.s32 7, %v1729_v2  ;;  %1342 = vmatprep.subr.mxu1 %v1616_v22  ;;  %v445_v30 = vld [vmem:[#allocation8 + $0x18] sm:$0xff]  ;;  %v444_v34 = vld [vmem:[#allocation8 + $0x10] sm:$0xff] }
  0x59   :  { %v1740_v8 = vrot.slane %v146_v7, %v158_v3  ;;  %v152_v9 = vrot.slane %v146_v7, %v1733_v4  ;;  %v1748_v12 = vrot.slane %v146_v7, %v165_v5  ;;  %v1750_v13 = vrot.slane %v146_v7, %v172_v6  ;;  %v1799_v35 = vld [vmem:[#allocation2 + $0x18] sm:$0xff]  ;;  %v1801_v36 = vld [vmem:[#allocation5] sm:$0xff]  ;;  %v443_v38 = vld [vmem:[#allocation8 + $0x8] sm:$0xff]  ;;  %s1619_s27 = smov [#allocation14]  }
  0x5a   :  { %v180_v17 = vrot.slane %v146_v7, %v179_v14  ;;  %v1759_v18 = vrot.slane %v146_v7, %v186_v15  ;;  %v1768_v24 = vrot.slane %v146_v7, %v193_v19  ;;  %v1770_v25 = vrot.slane %v146_v7, %v200_v20  ;;  %v1804_v37 = vld [vmem:[#allocation2 + $0x20] sm:$0xff]  ;;  %v1815_v39 = vld [vmem:[#allocation2 + $0x28] sm:$0xff]  ;;  %v1818_v40 = vld [vmem:[#allocation2 + $0x30] sm:$0xff]  ;;  %s1232_s28 = sshll.u32 %s1619_s27, 4  ;;  %s1233_s28 = int_to_ptr.vmem [resolvable:$true] %s1232_s28 }
  0x5b   :  { %161 = vbcast.lane.b32.xlu0 %v1740_v8, 256  ;;  %154 = vbcast.lane.b32.xlu1 %v152_v9, 256  ;;  %v442_v41 = vld [vmem:[#allocation8] sm:$0xff]  ;;  %v1828_v42 = vld [vmem:[#allocation2 + $0x38] sm:$0xff]  ;;  %vm569_vm8 = vcmask 1047559   ;;  %vm1224_vm9 = vcmask 257024   ;;  %p1581_p8 = scmp.lt.s32.totalorder %s1233_s28, %s1233_s28 }
  0x5c   :  { %1323 = vmatpush3.xpose.msk.msra.mxu0 %vm213_vm0, %v299_v16  ;;  %1343 = vmatpush3.xpose.msk.msra.mxu1 %vm213_vm0, %v448_v27 }
  0x5d   :  { %1324 = vmatprep.subr.msk.mxu0 %vm213_vm0, %v298_v21  ;;  %1344 = vmatprep.subr.mxu1 %v1616_v22 }
  0x5f   :  { %168 = vbcast.lane.b32.xlu0 %v1748_v12, 256  ;;  %175 = vbcast.lane.b32.xlu1 %v1750_v13, 256 }
  0x60   :  { %1325 = vmatpush3.xpose.msk.msra.mxu0 %vm213_vm0, %v298_v21  ;;  %1345 = vmatpush3.xpose.msk.msra.mxu1 %vm213_vm0, %v447_v29 }
  0x61   :  { %1326 = vmatprep.subr.msk.mxu0 %vm213_vm0, %v297_v26  ;;  %1346 = vmatprep.subr.mxu1 %v1616_v22 }
  0x63   :  { %182 = vbcast.lane.b32.xlu0 %v180_v17, 256  ;;  %189 = vbcast.lane.b32.xlu1 %v1759_v18, 256 }
  0x64   :  { %1327 = vmatpush3.xpose.msk.msra.mxu0 %vm213_vm0, %v297_v26  ;;  %1347 = vmatpush3.xpose.msk.msra.mxu1 %vm213_vm0, %v446_v32 }
  0x65   :  { %1351 = vmatprep.subr.mxu0 %v1616_v22  ;;  %1362 = vmatprep.subr.mxu1 %v1616_v22 }
  0x67   :  { %196 = vbcast.lane.b32.xlu0 %v1768_v24, 256  ;;  %203 = vbcast.lane.b32.xlu1 %v1770_v25, 256 }
  0x68   :  { %1329 = vmatmul.mubr.msk.f32.vlgmr.msra.gmra.mxu0 %vm213_vm0, %v1785_v31  ;;  %1349 = vmatmul.mubr.msk.f32.vlgmr.msra.gmra.mxu1 %vm213_vm0, %v1801_v36 }
  0x69   :  { %1352 = vmatpush3.xpose.msk.msra.mxu0 %vm213_vm0, %v445_v30  ;;  %1331 = vmatprep.mubr.msk.f32.mxu0 %vm213_vm0, %v1788_v33 }
  0x6a   :  { %1353 = vmatprep.subr.mxu0 %v1616_v22  ;;  %1370 = vmatprep.mubr.msk.f32.mxu1 %vm1617_vm1, %v1616_v22 }
  0x6b   :  { %272 = vperm.xlu0 %1398, %v147_v28   ;;  %846 = vbcast.lane.b32.xlu1 %v152_v9, 256 }
  0x6c   :  { %1332 = vmatmul.mubr.msk.f32.gmra.mxu0 %vm213_vm0, %v1799_v35 }
  0x6d   :  { %1354 = vmatpush3.xpose.msk.msra.mxu0 %vm213_vm0, %v444_v34  ;;  %1334 = vmatprep.mubr.msk.f32.mxu0 %vm213_vm0, %v1804_v37 }
  0x6e   :  { %1355 = vmatprep.subr.mxu0 %v1616_v22 }
  0x6f   :  { %853 = vbcast.lane.b32.xlu0 %v1740_v8, 256  ;;  %860 = vbcast.lane.b32.xlu1 %v1748_v12, 256 }
  0x70   :  { %1335 = vmatmul.mubr.msk.f32.gmra.mxu0 %vm213_vm0, %v1815_v39 }
  0x71   :  { %1356 = vmatpush3.xpose.msk.msra.mxu0 %vm213_vm0, %v443_v38  ;;  %1337 = vmatprep.mubr.msk.f32.mxu0 %vm213_vm0, %v1818_v40 }
  0x72   :  { %1357 = vmatprep.subr.mxu0 %v1616_v22 }
  0x73   :  { %874 = vbcast.lane.b32.xlu0 %v180_v17, 256  ;;  %867 = vbcast.lane.b32.xlu1 %v1750_v13, 256 }
  0x74   :  { %1338 = vmatmul.mubr.msk.f32.gmra.mxu0 %vm213_vm0, %v1828_v42 }
  0x75   :  { %1358 = vmatpush3.xpose.msk.msra.mxu0 %vm213_vm0, %v442_v41  ;;  %1359 = vmatprep.mubr.msk.f32.mxu0 %vm1617_vm1, %v1616_v22 }
  0x76   :  { %1373 = vmatprep.subr.mxu0 %v1616_v22 }
  0x77   :  { %881 = vbcast.lane.b32.xlu1 %v1759_v18, 256 }
  0xcd   :  { %v162_v43 = vpop.permute.xlu0 %161  ;;  %v155_v44 = vpop.permute.xlu1 %154 }
  0xce   :  { %v206_v45 = vmul.f32 %v162_v43, %v1785_v31  ;;  %v205_v46 = vmul.f32 %v155_v44, %v1743_v10 }
  0xd0   :  { %v221_v47 = vsel %vm213_vm0, %v206_v45, 0.0  ;;  %v214_v48 = vsel %vm213_vm0, %v205_v46, 0.0 }
  0xd1   :  { %v222_v49 = vrot.slane %v221_v47, 4  ;;  %v215_v50 = vrot.slane %v214_v48, 4  ;;  %v169_v51 = vpop.permute.xlu0 %168  ;;  %v176_v52 = vpop.permute.xlu1 %175 }
  0xd2   :  { %v207_v53 = vmul.f32 %v169_v51, %v1788_v33  ;;  %v208_v54 = vmul.f32 %v176_v52, %v1799_v35 }
  0xd3   :  { %v223_v57 = vadd.f32 %v222_v49, %v221_v47  ;;  %v216_v58 = vadd.f32 %v215_v50, %v214_v48 }
  0xd4   :  { %v228_v55 = vsel %vm213_vm0, %v207_v53, 0.0  ;;  %v235_v56 = vsel %vm213_vm0, %v208_v54, 0.0 }
  0xd5   :  { %v229_v59 = vrot.slane %v228_v55, 4  ;;  %v236_v60 = vrot.slane %v235_v56, 4  ;;  %v183_v61 = vpop.permute.xlu0 %182  ;;  %v190_v62 = vpop.permute.xlu1 %189  ;;  %v224_v7 = vrot.slane %v223_v57, 2  ;;  %v217_v8 = vrot.slane %v216_v58, 2 }
  0xd6   :  { %v209_v63 = vmul.f32 %v183_v61, %v1804_v37  ;;  %v210_v0 = vmul.f32 %v190_v62, %v1815_v39 }
  0xd7   :  { %v230_v1 = vadd.f32 %v229_v59, %v228_v55  ;;  %v237_v3 = vadd.f32 %v236_v60, %v235_v56  ;;  %v225_v23 = vadd.f32 %v224_v7, %v223_v57  ;;  %v218_v26 = vadd.f32 %v217_v8, %v216_v58 }
  0xd8   :  { %v242_v5 = vsel %vm213_vm0, %v209_v63, 0.0  ;;  %v249_v6 = vsel %vm213_vm0, %v210_v0, 0.0 }
  0xd9   :  { %v231_v9 = vrot.slane %v230_v1, 2  ;;  %v238_v11 = vrot.slane %v237_v3, 2  ;;  %v197_v12 = vpop.permute.xlu0 %196  ;;  %v204_v13 = vpop.permute.xlu1 %203  ;;  %v243_v14 = vrot.slane %v242_v5, 4  ;;  %v250_v15 = vrot.slane %v249_v6, 4 }
  0xda   :  { %v211_v16 = vmul.f32 %v197_v12, %v1818_v40  ;;  %v212_v17 = vmul.f32 %v204_v13, %v1828_v42  ;;  %v226_v45 = vrot.slane %v225_v23, 1  ;;  %v219_v48 = vrot.slane %v218_v26, 1 }
  0xdb   :  { %v244_v18 = vadd.f32 %v243_v14, %v242_v5  ;;  %v251_v19 = vadd.f32 %v250_v15, %v249_v6  ;;  %v232_v29 = vadd.f32 %v231_v9, %v230_v1  ;;  %v239_v30 = vadd.f32 %v238_v11, %v237_v3 }
  0xdc   :  { %v256_v20 = vsel %vm213_vm0, %v211_v16, 0.0  ;;  %v263_v21 = vsel %vm213_vm0, %v212_v17, 0.0  ;;  %v227_v55 = vadd.f32 %v226_v45, %v225_v23  ;;  %v220_v58 = vadd.f32 %v219_v48, %v218_v26 }
  0xdd   :  { %v257_v27 = vrot.slane %v256_v20, 4  ;;  %v264_v28 = vrot.slane %v263_v21, 4  ;;  %v245_v32 = vrot.slane %v244_v18, 2  ;;  %v252_v34 = vrot.slane %v251_v19, 2 }
  0xde   :  { %v233_v49 = vrot.slane %v232_v29, 1  ;;  %v240_v50 = vrot.slane %v239_v30, 1 }
  0xdf   :  { %v258_v38 = vadd.f32 %v257_v27, %v256_v20  ;;  %v265_v41 = vadd.f32 %v264_v28, %v263_v21  ;;  %v246_v43 = vadd.f32 %v245_v32, %v244_v18  ;;  %v253_v44 = vadd.f32 %v252_v34, %v251_v19 }
  0xe0   :  { %v234_v59 = vadd.f32 %v233_v49, %v232_v29  ;;  %v241_v60 = vadd.f32 %v240_v50, %v239_v30 }
  0xe1   :  { %v259_v46 = vrot.slane %v258_v38, 2  ;;  %v266_v47 = vrot.slane %v265_v41, 2  ;;  %v247_v51 = vrot.slane %v246_v43, 1  ;;  %v254_v52 = vrot.slane %v253_v44, 1 }
  0xe3   :  { %v260_v53 = vadd.f32 %v259_v46, %v258_v38  ;;  %v267_v54 = vadd.f32 %v266_v47, %v265_v41  ;;  %v248_v61 = vadd.f32 %v247_v51, %v246_v43  ;;  %v255_v63 = vadd.f32 %v254_v52, %v253_v44 }
  0xe5   :  { %v261_v56 = vrot.slane %v260_v53, 1  ;;  %v268_v57 = vrot.slane %v267_v54, 1 }
  0xe6   :  { %v273_v62 = vpop.permute.xlu0 %272 }
  0xe7   :  { %v262_v0 = vadd.f32 %v261_v56, %v260_v53  ;;  %v274_v1 = vrot.slane %v273_v62, 1  ;;  %v275_v3 = vrot.slane %v273_v62, 2  ;;  %v269_v5 = vadd.f32 %v268_v57, %v267_v54  ;;  %v1256_v56 = vld [vmem:[%s1945_s7] ss:$0 sm:$0xff] }
  0xe8   :  { %v276_v6 = vrot.slane %v273_v62, 3  ;;  %v277_v7 = vrot.slane %v273_v62, 4  ;;  %v278_v8 = vrot.slane %v273_v62, 5  ;;  %v279_v12 = vrot.slane %v273_v62, 6 }
  0xe9   :  { %v290_v9 = vmul.f32 %v274_v1, %v227_v55  ;;  %v291_v11 = vmul.f32 %v275_v3, %v234_v59  ;;  %v280_v13 = vrot.slane %v273_v62, 7  ;;  %v289_v16 = vmul.f32 %v273_v62, %v220_v58 }
  0xea   :  { %v292_v14 = vmul.f32 %v276_v6, %v241_v60  ;;  %v293_v15 = vmul.f32 %v277_v7, %v248_v61  ;;  %v294_v19 = vmul.f32 %v278_v8, %v255_v63  ;;  %v295_v20 = vmul.f32 %v279_v12, %v262_v0 }
  0xeb   :  { %v550_v17 = vrot.slane %v290_v9, 7  ;;  %v553_v18 = vrot.slane %v291_v11, 6  ;;  %v296_v21 = vmul.f32 %v280_v13, %v269_v5  ;;  %v1618_v53 = vmov 1966171168  }
  0xec   :  { %v556_v26 = vrot.slane %v292_v14, 5  ;;  %v559_v28 = vrot.slane %v293_v15, 4  ;;  %v562_v30 = vrot.slane %v294_v19, 3  ;;  %v565_v34 = vrot.slane %v295_v20, 2 }
  0xed   :  { %v552_v23 = vsel %vm551_vm2, %v550_v17, %v289_v16  ;;  %v568_v41 = vrot.slane %v296_v21, 1  ;;  %v658_v54 = vunpack.c.l.s4 %v1618_v53 }
  0xee   :  { %v555_v27 = vsel %vm554_vm3, %v553_v18, %v552_v23 }
  0xef   :  { %v558_v29 = vsel %vm557_vm4, %v556_v26, %v555_v27  ;;  %v659_v57 = vunpack.c.0.s8 %v658_v54 }
  0xf0   :  { %v561_v32 = vsel %vm560_vm5, %v559_v28, %v558_v29 }
  0xf1   :  { %v564_v38 = vsel %vm563_vm6, %v562_v30, %v561_v32  ;;  %v662_v60 = vsub.s32 %v659_v57, %v1729_v2 }
  0xf2   :  { %v567_v43 = vsel %vm566_vm7, %v565_v34, %v564_v38 }
  0xf3   :  { %v570_v44 = vsel %vm569_vm8, %v568_v41, %v567_v43 }
  0xf4   :  { %1360 = vmatmul.mubr.msk.f32.vlgmr.msra.gmra.mxu0 %vm213_vm0, %v570_v44 }
  0xf5   :  { %1381 = vmatprep.mubr.msk.f32.mxu0 %vm1617_vm1, %v1616_v22 }
 0x128   :  { %v538_v45 = vpop.f32.mrf.mxu1  ;;  %v1330_v47 = vpop.f32.mrf.mxu0 }
 0x129   :  { %v539_v58 = vadd.f32 %v1256_v56, %v538_v45 }
 0x12a   :  { %v1350_v46 = vpop.f32.mrf.mxu1  ;;  %v403_v48 = vpop.f32.mrf.mxu0 }
 0x12c   :  { %v1333_v49 = vpop.f32.mrf.mxu0 }
 0x12e   :  { %v413_v50 = vpop.f32.mrf.mxu0 }
 0x130   :  { %v1336_v51 = vpop.f32.mrf.mxu0 }
 0x132   :  { %v423_v52 = vpop.f32.mrf.mxu0 }
 0x134   :  { %v1339_v55 = vpop.f32.mrf.mxu0 }
 0x136   :  { %v433_v59 = vpop.f32.mrf.mxu0 }
 0x1b4   :  { %v651_v61 = vpop.f32.mrf.mxu0 }
 0x1b5   :  { %v652_v62 = vadd.f32 %v651_v61, %v539_v58 }
 0x1b6   :  { %v1361_v63 = vpop.f32.mrf.mxu0 }
 0x1b7   :  { %v656_v0 = vcombine.high %v652_v62, %v652_v62  ;;  %v663_v1 = vrot.slane %v652_v62, %v662_v60 }
 0x1b9   :  { %v670_v3 = vrot.slane %v656_v0, %v662_v60  ;;  %v671_v5 = vcombine.high %v663_v1, %v663_v1  ;;  %v679_v6 = vrot.slane %v663_v1, %v662_v60  ;;  %v1275_v1 = vld [vmem:[%s1946_s8] ss:$0 sm:$0xff] }
 0x1bb   :  { %v672_v7 = vcombine.high %v670_v3, %v670_v3  ;;  %v686_v8 = vrot.slane %v670_v3, %v662_v60  ;;  %v693_v9 = vrot.slane %v671_v5, %v662_v60  ;;  %v701_v11 = vcombine.high %v679_v6, %v679_v6 }
 0x1bc   :  { %v708_v12 = vrot.slane %v679_v6, %v1733_v4 }
 0x1bd   :  { %v700_v13 = vrot.slane %v672_v7, %v662_v60  ;;  %v702_v14 = vcombine.high %v686_v8, %v686_v8  ;;  %v703_v15 = vcombine.high %v693_v9, %v693_v9  ;;  %v712_v16 = vrot.slane %v693_v9, %v1733_v4 }
 0x1be   :  { %v716_v2 = vrot.slane %v701_v11, %v1733_v4  ;;  %v724_v17 = vrot.slane %v686_v8, %v1733_v4  ;;  %v745_v18 = vadd.f32 %v708_v12, %v403_v48 }
 0x1bf   :  { %v704_v19 = vcombine.high %v700_v13, %v700_v13  ;;  %v720_v20 = vrot.slane %v703_v15, %v1733_v4  ;;  %v728_v21 = vrot.slane %v700_v13, %v1733_v4  ;;  %v732_v23 = vrot.slane %v702_v14, %v1733_v4 }
 0x1c0   :  { %v746_v26 = vadd.f32 %v1330_v47, %v712_v16  ;;  %v747_v27 = vadd.f32 %v716_v2, %v413_v50  ;;  %v749_v28 = vadd.f32 %v724_v17, %v423_v52  ;;  %v1267_v29 = vmul.f32 -1.442695, %v745_v18 }
 0x1c1   :  { %v736_v30 = vrot.slane %v704_v19, %v1733_v4  ;;  %v748_v32 = vadd.f32 %v1333_v49, %v720_v20  ;;  %v750_v34 = vadd.f32 %v1336_v51, %v728_v21  ;;  %v751_v38 = vadd.f32 %v732_v23, %v433_v59 }
 0x1c2   :  { %1400 = vpow2.f32 %v1267_v29  ;;  %v1268_v41 = vmul.f32 -1.442695, %v746_v26  ;;  %v1269_v43 = vmul.f32 -1.442695, %v747_v27  ;;  %v1271_v46 = vmul.f32 -1.442695, %v749_v28 }
 0x1c3   :  { %v752_v44 = vadd.f32 %v1339_v55, %v736_v30  ;;  %v1270_v45 = vmul.f32 -1.442695, %v748_v32  ;;  %v1272_v48 = vmul.f32 -1.442695, %v750_v34  ;;  %v1273_v53 = vmul.f32 -1.442695, %v751_v38  ;;  %v847_v32 = vpop.permute.xlu1 %846 }
 0x1c4   :  { %1402 = vpow2.f32 %v1268_v41  ;;  %v854_v41 = vpop.permute.xlu0 %853 }
 0x1c5   :  { %1404 = vpow2.f32 %v1269_v43  ;;  %v1274_v47 = vmul.f32 -1.442695, %v752_v44 }
 0x1c6   :  { %1406 = vpow2.f32 %v1270_v45 }
 0x1c7   :  { %1408 = vpow2.f32 %v1271_v46  ;;  %v861_v34 = vpop.permute.xlu1 %860 }
 0x1c8   :  { %1410 = vpow2.f32 %v1272_v48  ;;  %v875_v44 = vpop.permute.xlu0 %874 }
 0x1c9   :  { %1412 = vpow2.f32 %v1273_v53 }
 0x1ca   :  { %1414 = vpow2.f32 %v1274_v47 }
 0x1cb   :  { %v868_v38 = vpop.permute.xlu1 %867 }
 0x1cf   :  { %v1401_v4 = vpop.eup %1400  ;;  %v882_v43 = vpop.permute.xlu1 %881 }
 0x1d0   :  { %v777_v49 = vadd.f32 1.0, %v1401_v4 }
 0x1d1   :  { %v1403_v50 = vpop.eup %1402 }
 0x1d2   :  { %v1405_v51 = vpop.eup %1404  ;;  %v778_v52 = vadd.f32 1.0, %v1403_v50  ;;  %1416 = vrcp.f32 %v777_v49 }
 0x1d3   :  { %v1407_v54 = vpop.eup %1406  ;;  %v779_v55 = vadd.f32 1.0, %v1405_v51 }
 0x1d4   :  { %v1409_v56 = vpop.eup %1408  ;;  %1418 = vrcp.f32 %v778_v52  ;;  %v780_v57 = vadd.f32 1.0, %v1407_v54 }
 0x1d5   :  { %v1411_v58 = vpop.eup %1410  ;;  %v781_v59 = vadd.f32 1.0, %v1409_v56  ;;  %1420 = vrcp.f32 %v779_v55 }
 0x1d6   :  { %v1413_v60 = vpop.eup %1412  ;;  %1422 = vrcp.f32 %v780_v57  ;;  %v782_v61 = vadd.f32 1.0, %v1411_v58 }
 0x1d7   :  { %v1415_v62 = vpop.eup %1414  ;;  %1424 = vrcp.f32 %v781_v59  ;;  %v783_v63 = vadd.f32 1.0, %v1413_v60  ;;  %v1131_v60 = vld [vmem:[#allocation13 + $0x18] sm:$0xff] }
 0x1d8   :  { %1426 = vrcp.f32 %v782_v61  ;;  %v784_v0 = vadd.f32 1.0, %v1415_v62  ;;  %1374 = vmatpush3.xpose.msk.msra.mxu0 %vm213_vm0, %v1131_v60  ;;  %v1020_v61 = vld [vmem:[#allocation11 + $0x18] sm:$0xff]  ;;  %v1130_v62 = vld [vmem:[#allocation13 + $0x10] sm:$0xff] }
 0x1d9   :  { %1428 = vrcp.f32 %v783_v63  ;;  %1375 = vmatprep.subr.mxu0 %v1616_v22  ;;  %1363 = vmatpush3.xpose.msk.msra.mxu1 %vm213_vm0, %v1020_v61  ;;  %v1019_v63 = vld [vmem:[#allocation11 + $0x10] sm:$0xff] }
 0x1da   :  { %1430 = vrcp.f32 %v784_v0  ;;  %1364 = vmatprep.subr.mxu1 %v1616_v22  ;;  %v1129_v0 = vld [vmem:[#allocation13 + $0x8] sm:$0xff] }
 0x1dc   :  { %1376 = vmatpush3.xpose.msk.msra.mxu0 %vm213_vm0, %v1130_v62 }
 0x1dd   :  { %1377 = vmatprep.subr.mxu0 %v1616_v22  ;;  %1365 = vmatpush3.xpose.msk.msra.mxu1 %vm213_vm0, %v1019_v63 }
 0x1de   :  { %1366 = vmatprep.subr.mxu1 %v1616_v22 }
 0x1df   :  { %v1417_v3 = vpop.eup %1416 }
 0x1e0   :  { %v808_v5 = vmul.f32 %v1417_v3, %v1275_v1  ;;  %1378 = vmatpush3.xpose.msk.msra.mxu0 %vm213_vm0, %v1129_v0  ;;  %v1128_v3 = vld [vmem:[#allocation13] sm:$0xff] }
 0x1e1   :  { %v1419_v6 = vpop.eup %1418  ;;  %1379 = vmatprep.subr.mxu0 %v1616_v22 }
 0x1e2   :  { %v1421_v7 = vpop.eup %1420  ;;  %v816_v8 = vsel %vm213_vm0, %v808_v5, 0.0  ;;  %v809_v9 = vmul.f32 %v1419_v6, %v1275_v1  ;;  %v1017_v5 = vld [vmem:[#allocation11] sm:$0xff] }
 0x1e3   :  { %v1423_v11 = vpop.eup %1422  ;;  %817 = vadd.xlane.f32.xlu1 %v816_v8  ;;  %v810_v12 = vmul.f32 %v1421_v7, %v1275_v1 }
 0x1e4   :  { %v1425_v13 = vpop.eup %1424  ;;  %v819_v14 = vsel %vm213_vm0, %v809_v9, 0.0  ;;  %v811_v15 = vmul.f32 %v1423_v11, %v1275_v1  ;;  %1380 = vmatpush3.xpose.msk.msra.mxu0 %vm213_vm0, %v1128_v3 }
 0x1e5   :  { %v1427_v16 = vpop.eup %1426  ;;  %820 = vadd.xlane.f32.xlu0 %v819_v14  ;;  %v822_v2 = vsel %vm213_vm0, %v810_v12, 0.0  ;;  %v812_v17 = vmul.f32 %v1425_v13, %v1275_v1 }
 0x1e6   :  { %v1429_v18 = vpop.eup %1428  ;;  %v825_v19 = vsel %vm213_vm0, %v811_v15, 0.0  ;;  %v813_v20 = vmul.f32 %v1427_v16, %v1275_v1 }
 0x1e7   :  { %823 = vadd.xlane.f32.xlu1 %v822_v2  ;;  %v1431_v21 = vpop.eup %1430  ;;  %v828_v23 = vsel %vm213_vm0, %v812_v17, 0.0  ;;  %v814_v26 = vmul.f32 %v1429_v18, %v1275_v1  ;;  %1382 = vmatmul.mubr.msk.f32.vlgmr.msra.gmra.mxu0 %vm213_vm0, %v1801_v36 }
 0x1e8   :  { %v831_v27 = vsel %vm213_vm0, %v813_v20, 0.0  ;;  %v815_v28 = vmul.f32 %v1431_v21, %v1275_v1  ;;  %v1018_v1 = vld [vmem:[#allocation11 + $0x8] sm:$0xff] }
 0x1e9   :  { %826 = vadd.xlane.f32.xlu0 %v825_v19  ;;  %v834_v29 = vsel %vm213_vm0, %v814_v26, 0.0  ;;  %1367 = vmatpush3.xpose.msk.msra.mxu1 %vm213_vm0, %v1018_v1 }
 0x1ea   :  { %v837_v30 = vsel %vm213_vm0, %v815_v28, 0.0  ;;  %1368 = vmatprep.subr.mxu1 %v1616_v22 }
 0x1eb   :  { %829 = vadd.xlane.f32.xlu1 %v828_v23 }
 0x1ed   :  { %832 = vadd.xlane.f32.xlu0 %v831_v27  ;;  %1369 = vmatpush3.xpose.msk.msra.mxu1 %vm213_vm0, %v1017_v5 }
 0x1ef   :  { %835 = vadd.xlane.f32.xlu1 %v834_v29 }
 0x1f1   :  { %838 = vadd.xlane.f32.xlu0 %v837_v30 }
 0x200   :  { %895 = vbcast.lane.b32.xlu1 %v1770_v25, 256 }
 0x207   :  { %888 = vbcast.lane.b32.xlu0 %v1768_v24, 256 }
 0x26c   :  { %v818_v45 = vpop.xlane.xlu1 %817 }
 0x26d   :  { %v905_v46 = vmul.f32 %v847_v32, %v818_v45 }
 0x26e   :  { %v821_v48 = vpop.xlane.xlu0 %820 }
 0x26f   :  { %v906_v53 = vmul.f32 %v854_v41, %v821_v48  ;;  %915 = vperm.xlu0 %1398, %v905_v46  }
 0x270   :  { %v824_v47 = vpop.xlane.xlu1 %823 }
 0x271   :  { %v907_v4 = vmul.f32 %v861_v34, %v824_v47  ;;  %920 = vperm.xlu1 %1399, %v906_v53  }
 0x272   :  { %v827_v49 = vpop.xlane.xlu0 %826 }
 0x273   :  { %v908_v50 = vmul.f32 %v868_v38, %v827_v49  ;;  %925 = vperm.xlu0 %1398, %v907_v4  }
 0x274   :  { %v830_v25 = vpop.xlane.xlu1 %829 }
 0x275   :  { %v909_v51 = vmul.f32 %v875_v44, %v830_v25  ;;  %930 = vperm.xlu1 %1399, %v908_v50  }
 0x276   :  { %v833_v24 = vpop.xlane.xlu0 %832 }
 0x277   :  { %v910_v52 = vmul.f32 %v882_v43, %v833_v24  ;;  %935 = vperm.xlu0 %1398, %v909_v51  }
 0x278   :  { %v836_v54 = vpop.xlane.xlu1 %835 }
 0x279   :  { %940 = vperm.xlu1 %1399, %v910_v52  }
 0x27a   :  { %v839_v55 = vpop.xlane.xlu0 %838 }
 0x27c   :  { %v896_v56 = vpop.permute.xlu1 %895 }
 0x27d   :  { %v912_v57 = vmul.f32 %v896_v56, %v839_v55 }
 0x27e   :  { %v889_v58 = vpop.permute.xlu0 %888 }
 0x27f   :  { %v911_v59 = vmul.f32 %v889_v58, %v836_v54  ;;  %950 = vperm.xlu1 %1399, %v912_v57  }
 0x281   :  { %945 = vperm.xlu0 %1398, %v911_v59  }
 0x2ea   :  { %v916_v6 = vpop.permute.xlu0 %915 }
 0x2eb   :  { %v953_v7 = vmul.f32 %v916_v6, %v1743_v10 }
 0x2ec   :  { %v921_v8 = vpop.permute.xlu1 %920 }
 0x2ed   :  { %v961_v9 = vsel %vm213_vm0, %v953_v7, 0.0  ;;  %v954_v11 = vmul.f32 %v921_v8, %v1785_v31 }
 0x2ee   :  { %v962_v12 = vrot.slane %v961_v9, 4  ;;  %v926_v13 = vpop.permute.xlu0 %925 }
 0x2ef   :  { %v968_v22 = vsel %vm213_vm0, %v954_v11, 0.0  ;;  %v955_v14 = vmul.f32 %v926_v13, %v1788_v33 }
 0x2f0   :  { %v963_v15 = vadd.f32 %v962_v12, %v961_v9  ;;  %v969_v16 = vrot.slane %v968_v22, 4  ;;  %v931_v2 = vpop.permute.xlu1 %930 }
 0x2f1   :  { %v975_v17 = vsel %vm213_vm0, %v955_v14, 0.0  ;;  %v956_v36 = vmul.f32 %v931_v2, %v1799_v35 }
 0x2f2   :  { %v964_v18 = vrot.slane %v963_v15, 2  ;;  %v970_v10 = vadd.f32 %v969_v16, %v968_v22  ;;  %v976_v19 = vrot.slane %v975_v17, 4  ;;  %v936_v20 = vpop.permute.xlu0 %935 }
 0x2f3   :  { %v982_v21 = vsel %vm213_vm0, %v956_v36, 0.0  ;;  %v957_v31 = vmul.f32 %v936_v20, %v1804_v37  ;;  %v1282_v20 = vld [vmem:[%s1950_s12] ss:$0 sm:$0xff]  ;;  %s1576_s12 = scalar_lea.vmem %s1233_s28, 64 }
 0x2f4   :  { %v965_v23 = vadd.f32 %v964_v18, %v963_v15  ;;  %v971_v26 = vrot.slane %v970_v10, 2  ;;  %v977_v27 = vadd.f32 %v976_v19, %v975_v17  ;;  %v983_v28 = vrot.slane %v982_v21, 4  ;;  %v941_v33 = vpop.permute.xlu1 %940  ;;  %p1577_p7 = scmp.ne.s32.totalorder %s1233_s28, %s1576_s12  ;;  %p1582_p9 = scmp.lt.s32.totalorder %s1576_s12, %s1576_s12 }
 0x2f5   :  { %v989_v29 = vsel %vm213_vm0, %v957_v31, 0.0  ;;  %v958_v30 = vmul.f32 %v941_v33, %v1815_v39  ;;  %v1276_v31 = vld [vmem:[%s1948_s10] ss:$0 sm:$0xff] }
 0x2f6   :  { %v972_v32 = vadd.f32 %v971_v26, %v970_v10  ;;  %v978_v34 = vrot.slane %v977_v27, 2  ;;  %v984_v35 = vadd.f32 %v983_v28, %v982_v21  ;;  %v990_v38 = vrot.slane %v989_v29, 4  ;;  %v1217_v10 = vpop.f32.mrf.mxu0  ;;  %p1583_p10 = por %p1582_p9, %p1581_p8 }
 0x2f7   :  { %v996_v41 = vsel %vm213_vm0, %v958_v30, 0.0  ;;  %v966_v43 = vrot.slane %v965_v23, 1  ;;  %v1218_v21 = vadd.f32 %v1282_v20, %v1217_v10 }
 0x2f8   :  { %v973_v44 = vrot.slane %v972_v32, 1  ;;  %v979_v45 = vadd.f32 %v978_v34, %v977_v27  ;;  %v985_v46 = vrot.slane %v984_v35, 2  ;;  %v991_v37 = vadd.f32 %v990_v38, %v989_v29  ;;  %v1383_v19 = vpop.f32.mrf.mxu0  ;;  %p1584_p11 = pnand %p1583_p10, %p1577_p7 }
 0x2f9   :  { %v997_v48 = vrot.slane %v996_v41, 4  ;;  %v967_v51 = vadd.f32 %v966_v43, %v965_v23  ;;  %1432 = vtanh.f32 %v1218_v21 }
 0x2fa   :  { %v980_v53 = vrot.slane %v979_v45, 1  ;;  %v986_v47 = vadd.f32 %v985_v46, %v984_v35  ;;  %v951_v4 = vpop.permute.xlu1 %950  ;;  %v974_v49 = vadd.f32 %v973_v44, %v972_v32  ;;  %v992_v50 = vrot.slane %v991_v37, 2 }
 0x2fb   :  { %v998_v25 = vadd.f32 %v997_v48, %v996_v41  ;;  %v960_v39 = vmul.f32 %v951_v4, %v1828_v42 }
 0x2fc   :  { %v987_v24 = vrot.slane %v986_v47, 1  ;;  %v946_v52 = vpop.permute.xlu0 %945  ;;  %v993_v54 = vadd.f32 %v992_v50, %v991_v37  ;;  %v981_v58 = vadd.f32 %v980_v53, %v979_v45  ;;  %v1036_v60 = vsel %vm551_vm2, %v974_v49, %v967_v51 }
 0x2fd   :  { %v999_v55 = vrot.slane %v998_v25, 2  ;;  %v1010_v56 = vsel %vm213_vm0, %v960_v39, 0.0  ;;  %v959_v57 = vmul.f32 %v946_v52, %v1818_v40 }
 0x2fe   :  { %v1011_v59 = vrot.slane %v1010_v56, 4  ;;  %v994_v63 = vrot.slane %v993_v54, 1  ;;  %v988_v42 = vadd.f32 %v987_v24, %v986_v47  ;;  %v1037_v3 = vsel %vm554_vm3, %v981_v58, %v1036_v60 }
 0x2ff   :  { %v1000_v61 = vadd.f32 %v999_v55, %v998_v25  ;;  %v1003_v62 = vsel %vm213_vm0, %v959_v57, 0.0 }
 0x300   :  { %v1012_v0 = vadd.f32 %v1011_v59, %v1010_v56  ;;  %v1004_v1 = vrot.slane %v1003_v62, 4  ;;  %v995_v8 = vadd.f32 %v994_v63, %v993_v54  ;;  %v1038_v40 = vsel %vm557_vm4, %v988_v42, %v1037_v3 }
 0x301   :  { %v1001_v7 = vrot.slane %v1000_v61, 1 }
 0x302   :  { %v1013_v5 = vrot.slane %v1012_v0, 2  ;;  %v1005_v6 = vadd.f32 %v1004_v1, %v1003_v62  ;;  %v1039_v14 = vsel %vm560_vm5, %v995_v8, %v1038_v40 }
 0x303   :  { %v1002_v13 = vadd.f32 %v1001_v7, %v1000_v61 }
 0x304   :  { %v1014_v9 = vadd.f32 %v1013_v5, %v1012_v0  ;;  %v1006_v11 = vrot.slane %v1005_v6, 2 }
 0x305   :  { %v1040_v17 = vsel %vm563_vm6, %v1002_v13, %v1039_v14 }
 0x306   :  { %v1007_v12 = vadd.f32 %v1006_v11, %v1005_v6  ;;  %v1015_v22 = vrot.slane %v1014_v9, 1  ;;  %v1433_v28 = vpop.eup %1432 }
 0x308   :  { %v1008_v15 = vrot.slane %v1007_v12, 1  ;;  %v1016_v2 = vadd.f32 %v1015_v22, %v1014_v9 }
 0x30a   :  { %v1009_v16 = vadd.f32 %v1008_v15, %v1007_v12 }
 0x30c   :  { %v1041_v36 = vsel %vm566_vm7, %v1009_v16, %v1040_v17 }
 0x30d   :  { %v1042_v18 = vsel %vm569_vm8, %v1016_v2, %v1041_v36 }
 0x30e   :  { %1371 = vmatmul.mubr.msk.f32.vlgmr.msra.gmra.mxu1 %vm213_vm0, %v1042_v18 }
 0x3ce   :  { %v1123_v23 = vpop.f32.mrf.mxu1 }
 0x3cf   :  { %v1124_v26 = vadd.f32 %v1276_v31, %v1123_v23 }
 0x3d0   :  { %v1372_v27 = vpop.f32.mrf.mxu1 }
 0x3d1   :  { %1434 = vtanh.f32 %v1124_v26 }
 0x3de   :  { %v1435_v33 = vpop.eup %1434 }
 0x3df   :  { %v1222_v29 = vmul.f32 %v1435_v33, %v1433_v28 }
 0x3e1   :  { %v1223_v30 = vpack.c.bf16 %v1222_v29, %v1222_v29 }
 0x3e3   :  { %1225 = vst.msk [vmem:[#allocation14] sm:$0xf] %vm1224_vm9, %v1223_v30 }
 0x3e4   :  { %1587 = shalt.err (!%p1584_p11)
}
 0x3e5   :  { %1235 = dma.vmem_to_hbm [thread:$0]  %s1233_s28, 64, %s1951_s13, [#allocation4]  }
 0x3e6   :  { %1604 = dma.done.wait [#allocation4], 64  }
 0x3e7   :  { %1605 = vsyncadd [#allocation4], 4294967232 }
 0x3e8   :  { %1239 = vsyncpa [#allocation3], 1 }
 0x3e9   :  { %1240 = vsyncpa [#allocation6], 1 }
 0x3ea   :  { %1241 = vsyncpa [#allocation9], 1 }
 0x3eb   :  { %1242 = vsyncpa [#allocation12], 1 }
 0x3ec   :  { %1243 = vsyncpa [#allocation4], 1 }

</bundles_post_ra>
